<compile_context>
chip_gen: v7x
topology: tpu7x:2x2x1
jax: 0.10.0
libtpu: 0.0.40
codegen_flags: <defaults>
</compile_context>

<pallas_src>
import jax
import jax.numpy as jnp
from jax.experimental import pallas as pl
from jax.experimental.pallas import tpu as pltpu


def _pointwise_conv_kernel(x_ref, w_ref, b_ref, o_ref):
    # x_ref: (C_in, tS)   -- channels on sublanes, spatial tile on lanes
    # w_ref: (C_out, C_in)
    # b_ref: (C_out, 1)   -- f32 bias
    # o_ref: (C_out, tS)  -- lane-dense output tile
    acc = jnp.dot(w_ref[...], x_ref[...], preferred_element_type=jnp.float32)
    o_ref[...] = (acc + b_ref[...]).astype(o_ref.dtype)


def output_layer_pallas(x_ncdhw, weight, bias, *, tile_s=32768, out_dtype=None,
                        vmem_limit_bytes=32 << 20):
    """Apply 1x1x1 Conv3d (with bias) to an NCDHW tensor using Pallas.

    x_ncdhw: (N, C_in, D, H, W)  -- compute dtype follows x (f32 or bf16)
    weight : (C_out, C_in)       -- squeezed 1x1x1 conv weight
    bias   : (C_out,)
    out_dtype: optional output dtype override (default: x.dtype)
    returns: (N, C_out, D, H, W)
    """
    N, C_in, D, H, W = x_ncdhw.shape
    C_out = weight.shape[0]
    S = D * H * W
    if out_dtype is None:
        out_dtype = x_ncdhw.dtype

    # Pure reshape (NCDHW layout kept end-to-end); no transpose traffic.
    x = x_ncdhw.reshape(N, C_in, S)
    # Weight is tiny: casting it to the input compute dtype is free.  Do NOT
    # cast x here -- that would add a full extra HBM pass on a bandwidth-bound
    # op; a bf16 input must come from the producer already in bf16.
    w = weight.astype(x.dtype)
    b = bias.astype(jnp.float32).reshape(C_out, 1)

    # Spatial tile: multiple of 128 lanes, no bigger than S needs.
    tS = min(int(tile_s), pl.cdiv(S, 128) * 128)
    tS = max(tS, 128)
    n_stiles = pl.cdiv(S, tS)

    # Spatial-tile axis first so megacore sharding works even when N == 1.
    grid = (n_stiles, N)

    cost = pl.CostEstimate(
        flops=2 * N * C_out * C_in * S,
        transcendentals=0,
        bytes_accessed=(N * C_in * S * x.dtype.itemsize
                        + N * C_out * S * jnp.dtype(out_dtype).itemsize
                        + C_out * C_in * w.dtype.itemsize
                        + C_out * 4),
    )

    out = pl.pallas_call(
        _pointwise_conv_kernel,
        out_shape=jax.ShapeDtypeStruct((N, C_out, S), out_dtype),
        grid_spec=pltpu.PrefetchScalarGridSpec(
            num_scalar_prefetch=0,
            grid=grid,
            in_specs=[
                # Batch dim squeezed out; kernel sees (C_in, tS).
                pl.BlockSpec((None, C_in, tS), lambda s, n: (n, 0, s)),
                # Weight / bias: constant index_map -> kept VMEM-resident.
                pl.BlockSpec((C_out, C_in), lambda s, n: (0, 0)),
                pl.BlockSpec((C_out, 1), lambda s, n: (0, 0)),
            ],
            out_specs=pl.BlockSpec((None, C_out, tS), lambda s, n: (n, 0, s)),
        ),
        compiler_params=pltpu.CompilerParams(
            dimension_semantics=("parallel", "parallel"),
            vmem_limit_bytes=int(vmem_limit_bytes),
        ),
        cost_estimate=cost,
    )(x, w, b)

    return out.reshape(N, C_out, D, H, W)


if __name__ == "__main__":
    # Small shapes consistent with the module: in_channels=32, n_class=3
    N, C_in, C_out = 2, 32, 3
    D = H = W = 8

    key = jax.random.PRNGKey(0)
    kx, kw, kb = jax.random.split(key, 3)

    x = jax.random.normal(kx, (N, C_in, D, H, W), dtype=jnp.float32)
    # Conv3d weight is (C_out, C_in, 1, 1, 1); we use the squeezed (C_out, C_in).
    weight = jax.random.normal(kw, (C_out, C_in), dtype=jnp.float32) * 0.1
    bias = jax.random.normal(kb, (C_out,), dtype=jnp.float32) * 0.1

    # Reference (plain JAX).
    y_ref = jnp.einsum("ncdhw,oc->nodhw", x, weight) + bias[None, :, None, None, None]

    # f32 path.
    y = output_layer_pallas(x, weight, bias)
    y = jax.block_until_ready(y)
    assert y.shape == (N, C_out, D, H, W)
    assert jnp.allclose(y, y_ref, atol=1e-4, rtol=1e-4)

    # bf16 input path (producer already supplies bf16 -> halved HBM read);
    # f32 accumulation, looser tolerance.
    x_bf16 = x.astype(jnp.bfloat16)
    y_bf16 = output_layer_pallas(x_bf16, weight, bias, out_dtype=jnp.float32)
    y_bf16 = jax.block_until_ready(y_bf16)
    assert y_bf16.shape == (N, C_out, D, H, W)
    assert jnp.allclose(y_bf16, y_ref, atol=5e-2, rtol=5e-2)

    print("KERNEL_OK")
</pallas_src>

<mosaic_0001>
module attributes {stable_mosaic.version = 11 : i64} {
  func.func @_pointwise_conv_kernel(%arg0: i32, %arg1: i32, %arg2: memref<1x32x512xf32, #tpu.memory_space<vmem>>, %arg3: memref<3x32xf32, #tpu.memory_space<vmem>>, %arg4: memref<3x1xf32, #tpu.memory_space<vmem>>, %arg5: memref<1x3x512xf32, #tpu.memory_space<vmem>>) attributes {dimension_semantics = [#tpu.dimension_semantics<parallel>, #tpu.dimension_semantics<parallel>], iteration_bounds = array<i64: 1, 2>, scalar_prefetch = 0 : i64, scratch_operands = 0 : i64, tpu.core_type = #tpu.core_type<tc>, window_params = [{transform_indices = @transform_0, window_bounds = array<i64: 1, 32, 512>}, {pipeline_mode = #tpu.pipeline_mode<synchronous>, transform_indices = @transform_1, window_bounds = array<i64: 3, 32>}, {pipeline_mode = #tpu.pipeline_mode<synchronous>, transform_indices = @transform_2, window_bounds = array<i64: 3, 1>}, {transform_indices = @transform_3, window_bounds = array<i64: 1, 3, 512>}]} {
    %c0 = arith.constant 0 : index
    %c0_0 = arith.constant 0 : index
    %0 = vector.load %arg3[%c0, %c0_0] : memref<3x32xf32, #tpu.memory_space<vmem>>, vector<3x32xf32>
    %c0_1 = arith.constant 0 : index
    %c0_2 = arith.constant 0 : index
    %c0_3 = arith.constant 0 : index
    %1 = vector.load %arg2[%c0_1, %c0_2, %c0_3] : memref<1x32x512xf32, #tpu.memory_space<vmem>>, vector<1x32x512xf32>
    %2 = vector.shape_cast %1 : vector<1x32x512xf32> to vector<32x512xf32>
    %cst = arith.constant dense<0.000000e+00> : vector<3x512xf32>
    %3 = tpu.matmul %0, %2, %cst {dimension_numbers = #tpu.dot_dimension_numbers<[1], [0], [0], [1], [0, 0, 1, 1], [], []>} : vector<3x32xf32>, vector<32x512xf32>, vector<3x512xf32> -> vector<3x512xf32>
    %c0_4 = arith.constant 0 : index
    %c0_5 = arith.constant 0 : index
    %4 = vector.load %arg4[%c0_4, %c0_5] : memref<3x1xf32, #tpu.memory_space<vmem>>, vector<3x1xf32>
    %5 = vector.broadcast %4 : vector<3x1xf32> to vector<3x512xf32>
    %6 = arith.addf %3, %5 : vector<3x512xf32>
    %c0_6 = arith.constant 0 : index
    %c0_7 = arith.constant 0 : index
    %c0_8 = arith.constant 0 : index
    %7 = vector.load %arg5[%c0_6, %c0_7, %c0_8] : memref<1x3x512xf32, #tpu.memory_space<vmem>>, vector<1x3x512xf32>
    %8 = vector.shape_cast %7 : vector<1x3x512xf32> to vector<3x512xf32>
    %9 = vector.shape_cast %6 : vector<3x512xf32> to vector<1x3x512xf32>
    tpu.vector_store %arg5[%c0_6, %c0_7, %c0_8], %9 {strides = array<i32>} : memref<1x3x512xf32, #tpu.memory_space<vmem>>, vector<1x3x512xf32>,
    return
  }
  func.func @transform_0(%arg0: i32, %arg1: i32) -> (i32, i32, i32) {
    %c0_i32 = arith.constant 0 : i32
    %c0_i32_0 = arith.constant 0 : i32
    return %arg1, %c0_i32, %arg0 : i32, i32, i32
  }
  func.func @transform_1(%arg0: i32, %arg1: i32) -> (i32, i32) {
    %c0_i32 = arith.constant 0 : i32
    %c0_i32_0 = arith.constant 0 : i32
    %c0_i32_1 = arith.constant 0 : i32
    return %c0_i32, %c0_i32_0 : i32, i32
  }
  func.func @transform_2(%arg0: i32, %arg1: i32) -> (i32, i32) {
    %c0_i32 = arith.constant 0 : i32
    %c0_i32_0 = arith.constant 0 : i32
    %c0_i32_1 = arith.constant 0 : i32
    return %c0_i32, %c0_i32_0 : i32, i32
  }
  func.func @transform_3(%arg0: i32, %arg1: i32) -> (i32, i32, i32) {
    %c0_i32 = arith.constant 0 : i32
    %c0_i32_0 = arith.constant 0 : i32
    return %arg1, %c0_i32, %arg0 : i32, i32, i32
  }
}

</mosaic_0001>

<bundles_post_ra>
// kernel: tpu_custom_call.1
= control target key start
LH: loop header
LB: loop body
LE: loop exit
PB: predicated region body
PF: predicated region fallthrough
CT: control target
= control target key end

     0   :  { %8 = vsyncpa [#allocation3], 0  ;;  %s841_s0 = inlined_call_operand.hbm [shape: f32[2,32,512], index: 0, kind: input, shape index: {}]   ;;  %s842_s1 = inlined_call_operand.vmem [shape: f32[3,32], index: 1, kind: input, shape index: {}]   ;;  %s843_s2 = inlined_call_operand.vmem [shape: f32[3,1], index: 2, kind: input, shape index: {}]   ;;  %s844_s3 = inlined_call_operand.vmem [shape: f32[2,3,512], index: 3, kind: output, shape index: {}]  }
   0x1   :  { %10 = vsyncpa [#allocation3 + $0x1], 0  ;;  %s693_s12 = smov 0   ;;  %s695_s13 = smov 0  }
   0x2   :  { %s697_s14 = smov 0   ;;  %s699_s15 = smov 0  }
   0x3   :  { %s701_s16 = smov 0   ;;  %s703_s17 = smov 0  }
   0x4 LB: > { %s493_s18 = sadd.s32 4294967295, %s666_s17   ;;  %s25_s19 = sadd.s32 1, %s662_s16  ;;  %s666_s17 = sphi %s703_s17, %s16_s17   ;;  %s662_s16 = sphi %s701_s16, %s852_s16   ;;  %s658_s15 = sphi %s699_s15, %s851_s15   ;;  %s654_s14 = sphi %s697_s14, %s850_s14   ;;  %s650_s13 = sphi %s695_s13, %s849_s13   ;;  %s646_s12 = sphi %s693_s12, %s848_s12  }
   0x5   : > { %p26_p0 = scmp.ge.s32.totalorder %s25_s19, 2  ;;  %s37_s20 = sadd.s32 1, %s654_s14 }
   0x6   : > { %p44_p1 = scmp.ne.s32.totalorder %s654_s14, %s650_s13  ;;  %p45_p2 = scmp.eq.s32.totalorder %s666_s17, 0 }
   0x7   : > { %s854_s19 = smov (%p26_p0, %s25_s19), 0  ;;  %p50_p4 = scmp.ne.s32.totalorder %s650_s13, %s646_s12 }
   0x8   : > { %p729_p3 = por %p45_p2, %p44_p1  ;;  %s32_s22 = ssub.s32 %s662_s16, %s854_s19 }
   0x9   : > { %p51_p5 = scmp.eq.s32.totalorder %s493_s18, 0  ;;  %p35_p6 = scmp.eq.s32.totalorder %s32_s22, 0 }
   0xa   : > { %p532_p8 = scmp.lt.s32.totalorder %s666_s17, 2  ;;  %s150_s25 = sand.u32 1, %s654_s14  }
   0xb   : > { %p736_p7 = por %p51_p5, %p50_p4  ;;  %s508_s26 = sshll.u32 %s662_s16, 11 }
   0xc   : > { %s742_s24 = scalar_select %p35_p6, %s654_s14, %s37_s20  }
   0xd   : > { %s497_s27 = sshll.u32 %s150_s25, 7  ;;  %s749_s30 = scalar_lea.hbm %s841_s0, %s508_s26 }
   0xe   : > { %s154_s4 = scalar_lea.vmem [#allocation2], %s497_s27  ;;  %p753_p9 = pnand %p532_p8, %p729_p3 }
   0xf   : > { %s163_s5 = sshll.u32 %s154_s4, 4  ;;  %s759_s7 = scalar_lea.sflag [#allocation3], %s150_s25  ;;  %s757_s5 = int_to_ptr.vmem [resolvable:$true] %s163_s5 }
  0x10   : > { %s586_s8 = scalar_lea.hbm %s749_s30, 2048  ;;  %p588_p11 = pneg %p753_p9 }
  0x11   : > { %p587_p10 = scmp.ne.s32.totalorder %s749_s30, %s586_s8  ;;  %s591_s11 = scalar_lea.hbm %s841_s0, 4096 }
  0x12   : > { %p592_p0 = scmp.lt.u32.totalorder %s749_s30, %s841_s0  ;;  %p593_p1 = scmp.lt.u32.totalorder %s591_s11, %s586_s8 }
  0x13   : > { %p589_p12 = pnand %p588_p11, %p587_p10  ;;  %p595_p3 = scmp.lt.u32.totalorder %s586_s8, %s749_s30 }
  0x14   : > { %p594_p2 = por %p593_p1, %p592_p0 }
  0x15   : > { %p590_p13 = pneg %p589_p12 }
  0x16   : > { %p596_p4 = por %p595_p3, %p594_p2 }
  0x18   : > { %p597_p5 = pnand %p596_p4, %p590_p13 }
  0x1a   : > { %600 = shalt.err (!%p597_p5)
}
  0x1b   : > { %s601_s20 = scalar_lea.vmem %s757_s5, 2048  ;;  %s668_s21 = smov [#allocation2]  }
  0x1c   : > { %p602_p6 = scmp.ne.s32.totalorder %s757_s5, %s601_s20  ;;  %s606_s22 = sshll.u32 %s668_s21, 4  ;;  %s607_s22 = int_to_ptr.vmem [resolvable:$false] %s606_s22 }
  0x1d   : > { %s608_s25 = scalar_lea.vmem %s607_s22, 4096  ;;  %p609_p12 = scmp.lt.s32.totalorder %s757_s5, %s607_s22 }
  0x1e   : > { %p604_p8 = pnand %p602_p6, %p588_p11  ;;  %p610_p0 = scmp.lt.s32.totalorder %s608_s25, %s601_s20 }
  0x20   : > { %p605_p10 = pneg %p604_p8  ;;  %p611_p1 = por %p610_p0, %p609_p12 }
  0x22   : > { %p612_p2 = pnand %p611_p1, %p605_p10 }
  0x24   : > { %615 = shalt.err (!%p612_p2)
}
  0x25   : > { %s669_s26 = smov 512   ;;  %s670_s27 = smov 32  }
  0x26   : > { %531 = dma.hbm_to_vmem [thread:$0]  (!%p753_p9), %s749_s30, 2048, %s757_s5, %s759_s7, %s669_s26, %s669_s26, %s670_s27  }
  0x27   : > { %p500_p11 = scmp.ge.s32.totalorder %s666_s17, 1  ;;  %p171_p13 = scmp.lt.s32.totalorder %s666_s17, 3 }
  0x29   : > { %p172_p3 = pnand %p500_p11, %p171_p13 }
  0x2a   : > { %s177_s28 = sand.u32 (!%p172_p3), 1, %s650_s13  }
  0x2b   : > { %175 = sbr.rel (%p172_p3) target bundleno = 282 (0x11a), region = 32  ;;  %s501_s29 = sshll.u32 (!%p172_p3), %s177_s28, 7 }
  0x2c   : > { %s178_s4 = scalar_lea.sflag (!%p172_p3), [#allocation3], %s177_s28  ;;  %s790_s8 = scalar_lea.vmem (!%p172_p3), [#allocation2], %s501_s29 }
  0x32   : > { %641 = dma.done.wait (%p736_p7), %s178_s4, 2048  }
  0x33   : > { %643 = vsyncadd (%p736_p7), %s178_s4, 4294965248  ;;  %v671_v0 = vmov 0.0   ;;  %v672_v1 = vmov 0   ;;  %v221_v2 = vld [vmem:[%s790_s8 + $0x8] sm:$0xff]  ;;  %v223_v4 = vld [vmem:[%s790_s8 + $0x18] sm:$0xff]  ;;  %vm242_vm0 = vcmask 261120  }
  0x34   : > { %310 = vmatprep.mubr.f32.mxu0 %v671_v0  ;;  %381 = vmatprep.mubr.f32.mxu1 %v671_v0  ;;  %v225_v3 = vld [vmem:[%s790_s8 + $0x28] sm:$0xff]  ;;  %v227_v6 = vld [vmem:[%s790_s8 + $0x38] sm:$0xff]  ;;  %v220_v7 = vld [vmem:[%s790_s8] sm:$0xff]  ;;  %p210_p7 = scmp.lt.s32.totalorder %s658_s15, 1 }
  0x35   : > { %585 = vset.pattern.permute.xlu0 %v672_v1  ;;  %v510_v5 = vpack.c.bf16 %v225_v3, %v221_v2  ;;  %v224_v8 = vld [vmem:[%s790_s8 + $0x20] sm:$0xff]  ;;  %v518_v9 = vpack.c.bf16 %v227_v6, %v223_v4  ;;  %v222_v11 = vld [vmem:[%s790_s8 + $0x10] sm:$0xff]  ;;  %v229_v13 = vld [vmem:[%s790_s8 + $0x48] sm:$0xff] }
  0x36   : > { %v512_v10 = vpack.c.bf16 %v224_v8, %v220_v7  ;;  %v226_v12 = vld [vmem:[%s790_s8 + $0x30] sm:$0xff]  ;;  %v233_v15 = vld [vmem:[%s790_s8 + $0x68] sm:$0xff]  ;;  %v231_v16 = vld [vmem:[%s790_s8 + $0x58] sm:$0xff]  ;;  %s856_s15 = smov (!%p210_p7, %s658_s15), 1 }
  0x37   : > { %511 = vmatprep.subr.bf16.mxu0 %v510_v5  ;;  %v520_v14 = vpack.c.bf16 %v226_v12, %v222_v11  ;;  %v235_v17 = vld [vmem:[%s790_s8 + $0x78] sm:$0xff]  ;;  %519 = vmatprep.subr.bf16.mxu1 %v518_v9  ;;  %v514_v18 = vpack.c.bf16 %v233_v15, %v229_v13  ;;  %v228_v20 = vld [vmem:[%s790_s8 + $0x40] sm:$0xff]  ;;  %v230_v22 = vld [vmem:[%s790_s8 + $0x50] sm:$0xff]  ;;  %s509_s7 = sshll.u32 %s856_s15, 4 }
  0x38   : > { %513 = vmatpush1.bf16.msra.mxu0 %v512_v10  ;;  %v522_v19 = vpack.c.bf16 %v235_v17, %v231_v16  ;;  %v232_v21 = vld [vmem:[%s790_s8 + $0x60] sm:$0xff]  ;;  %v234_v24 = vld [vmem:[%s790_s8 + $0x70] sm:$0xff]  ;;  %s217_s11 = scalar_lea.vmem %s844_s3, %s509_s7 }
  0x39   : > { %521 = vmatpush1.bf16.msra.mxu1 %v520_v14  ;;  %v516_v23 = vpack.c.bf16 %v232_v21, %v228_v20  ;;  %v236_v25 = vld [vmem:[%s843_s2] sm:$0x7]  ;;  %515 = vmatprep.subr.bf16.mxu0 %v514_v18  ;;  %v524_v26 = vpack.c.bf16 %v234_v24, %v230_v22 }
  0x3a   : > { %523 = vmatprep.subr.bf16.mxu1 %v522_v19  ;;  %239 = vperm.xlu0 %585, %v236_v25   ;;  %v219_v27 = vld [vmem:[%s842_s1] sm:$0x7] }
  0x3c   : > { %517 = vmatpush1.bf16.msra.mxu0 %v516_v23 }
  0x3d   : > { %525 = vmatpush1.bf16.msra.mxu1 %v524_v26 }
  0x3f   : > { %504 = vmatmul.mubr.msk.f32.vlgmr.msra.gmra.mrb[0].mxu0 %vm242_vm0, %v219_v27 }
  0x40   : > { %505 = vmatmul.mubr.msk.f32.vlgmr.msra.gmra.mrb[0].mxu1 %vm242_vm0, %v219_v27 }
  0xb9   : > { %v240_v28 = vpop.permute.xlu0 %239 }
 0x112   : > { %v312_v29 = vpop.f32.mrb[0].mxu0 }
 0x113   : > { %v313_v30 = vadd.f32 %v312_v29, %v240_v28  ;;  %v383_v31 = vpop.f32.mrb[0].mxu1  ;;  %v314_v32 = vpop.f32.mrb[1].mxu0 }
 0x114   : > { %v384_v33 = vadd.f32 %v383_v31, %v240_v28  ;;  %v315_v34 = vadd.f32 %v314_v32, %v240_v28  ;;  %v385_v35 = vpop.f32.mrb[1].mxu1 }
 0x115   : > { %v386_v36 = vadd.f32 %v385_v35, %v240_v28 }
 0x116   : > { %v392_v37 = vcombine.low %v313_v30, %v315_v34 }
 0x117   : > { %v393_v38 = vcombine.low %v384_v33, %v386_v36 }
 0x118   : > { %396 = vst [vmem:[%s217_s11] sm:$0x77] %v392_v37 }
 0x119   : > { %397 = vst [vmem:[%s217_s11 + $0x8] sm:$0x77] %v393_v38 }
 0x11a PF: > { %s16_s17 = sadd.s32 1, %s666_s17   ;;  %s848_s12 = smov %s650_s13 }
 0x11b   : > { %p13_p9 = scmp.ge.s32.totalorder %s16_s17, 4   ;;  %s849_s13 = smov %s654_s14 }
 0x11c   : > { %s850_s14 = smov %s742_s24  ;;  %s851_s15 = smov %s662_s16 }
 0x11d   : > { %s852_s16 = smov %s854_s19  ;;  %15 = sbr.rel (!%p13_p9) target bundleno = 4 (0x4), region = 72 }
 0x124   :  { %428 = vsyncpa [#allocation3], 1 }
 0x125   :  { %430 = vsyncpa [#allocation3 + $0x1], 1 }

</bundles_post_ra>
